<compile_context>
chip_gen: v5e
topology: v5e:2x2
jax: 0.10.0
libtpu: 0.0.40
codegen_flags: <defaults>
</compile_context>

<pallas_src>
import jax
import jax.numpy as jnp
from jax.experimental import pallas as pl
from jax.experimental.pallas import tpu as pltpu


def _round_up(x, m):
    return pl.cdiv(x, m) * m


def _mlp_head_kernel(x_ref, w1_ref, b1_ref, w2_ref, b2_ref, o_ref, acc_ref):
    k = pl.program_id(1)

    @pl.when(k == 0)
    def _init():
        # Fold b1 into the accumulator init (f32, broadcast over the batch tile).
        acc_ref[...] = jnp.broadcast_to(b1_ref[...], acc_ref.shape)

    # First linear, K-tiled reduction: acc += x_tile @ W1_block  (bf16 in, f32 acc).
    acc_ref[...] += jnp.dot(
        x_ref[...], w1_ref[...], preferred_element_type=jnp.float32
    )

    @pl.when(k == pl.num_programs(1) - 1)
    def _finalize():
        # Dropout(p=0.1): identity in eval mode.
        # Second linear: cast once right before the MXU, bias add in f32.
        h = acc_ref[...].astype(w2_ref.dtype)
        out = jnp.dot(h, w2_ref[...], preferred_element_type=jnp.float32)
        out = out + b2_ref[...]
        o_ref[...] = out.astype(o_ref.dtype)


def classifier_head2(x, w1, b1, w2, b2):
    """x: (B, D); w1: (D, D); b1: (1, D); w2: (D, C); b2: (1, C) -> (B, C)."""
    B, D = x.shape
    C = w2.shape[1]
    out_dtype = x.dtype

    # Padded / tiled geometry.
    d_pad = _round_up(D, 128)                      # reduction + hidden width
    c_pad = _round_up(C, 128)                      # lane-dense output width
    tm = min(256, _round_up(B, 8))                 # batch tile
    b_pad = _round_up(B, tm)
    # K tile over D for the first matmul (128-aligned, largest that divides d_pad).
    tk = 512 if d_pad % 512 == 0 else (256 if d_pad % 256 == 0 else 128)

    # Zero-pad + cast matmul operands to bf16 (MXU-native); biases stay f32.
    xp = jnp.zeros((b_pad, d_pad), jnp.bfloat16).at[:B, :D].set(x.astype(jnp.bfloat16))
    w1p = jnp.zeros((d_pad, d_pad), jnp.bfloat16).at[:D, :D].set(w1.astype(jnp.bfloat16))
    b1p = jnp.zeros((1, d_pad), jnp.float32).at[:, :D].set(b1.astype(jnp.float32))
    w2p = jnp.zeros((d_pad, c_pad), jnp.bfloat16).at[:D, :C].set(w2.astype(jnp.bfloat16))
    b2p = jnp.zeros((1, c_pad), jnp.float32).at[:, :C].set(b2.astype(jnp.float32))

    grid = (b_pad // tm, d_pad // tk)

    # VMEM budget: double-buffered bf16 tiles (x, W1 block, W2) + biases + out + f32 acc.
    vmem_bytes = int(
        2 * (tm * tk + tk * d_pad + d_pad * c_pad) * 2
        + 2 * (d_pad + c_pad) * 4
        + 2 * tm * c_pad * 4
        + tm * d_pad * 4
    )
    vmem_limit = min(max(2 * vmem_bytes, 16 * 1024 * 1024), 100 * 1024 * 1024)

    out = pl.pallas_call(
        _mlp_head_kernel,
        out_shape=jax.ShapeDtypeStruct((b_pad, c_pad), out_dtype),
        grid_spec=pltpu.PrefetchScalarGridSpec(
            num_scalar_prefetch=0,
            grid=grid,
            in_specs=[
                pl.BlockSpec((tm, tk), lambda i, k: (i, k)),        # x tile
                pl.BlockSpec((tk, d_pad), lambda i, k: (k, 0)),     # W1 K-block
                pl.BlockSpec((1, d_pad), lambda i, k: (0, 0)),      # b1 (resident)
                pl.BlockSpec((d_pad, c_pad), lambda i, k: (0, 0)),  # W2 (resident)
                pl.BlockSpec((1, c_pad), lambda i, k: (0, 0)),      # b2 (resident)
            ],
            out_specs=pl.BlockSpec((tm, c_pad), lambda i, k: (i, 0)),
            scratch_shapes=[pltpu.VMEM((tm, d_pad), jnp.float32)],
        ),
        compiler_params=pltpu.CompilerParams(
            dimension_semantics=("parallel", "arbitrary"),
            vmem_limit_bytes=vmem_limit,
        ),
    )(xp, w1p, b1p, w2p, b2p)

    return out[:B, :C]


def init_params(key, input_dim, num_classes, dtype=jnp.float32):
    """Deterministic init mimicking nn.Linear's U(-1/sqrt(fan_in), 1/sqrt(fan_in))."""
    k1, k2, k3, k4 = jax.random.split(key, 4)
    bound = 1.0 / (input_dim ** 0.5)
    # Stored as (in_features, out_features) == W^T relative to PyTorch.
    w1 = jax.random.uniform(k1, (input_dim, input_dim), dtype, -bound, bound)
    b1 = jax.random.uniform(k2, (1, input_dim), dtype, -bound, bound)
    w2 = jax.random.uniform(k3, (input_dim, num_classes), dtype, -bound, bound)
    b2 = jax.random.uniform(k4, (1, num_classes), dtype, -bound, bound)
    return w1, b1, w2, b2


if __name__ == "__main__":
    key = jax.random.PRNGKey(0)
    batch, input_dim, num_classes = 2, 32, 8

    kx, kp = jax.random.split(key)
    x = jax.random.normal(kx, (batch, input_dim), jnp.float32)
    w1, b1, w2, b2 = init_params(kp, input_dim, num_classes)

    out = classifier_head2(x, w1, b1, w2, b2)
    out = jax.block_until_ready(out)
    assert out.shape == (batch, num_classes)

    # Reference in plain JAX with the same bf16-operand / f32-accumulate numerics.
    xb = x.astype(jnp.bfloat16).astype(jnp.float32)
    w1b = w1.astype(jnp.bfloat16).astype(jnp.float32)
    w2b = w2.astype(jnp.bfloat16).astype(jnp.float32)
    h = jnp.dot(xb, w1b, precision=jax.lax.Precision.HIGHEST) + b1
    hb = h.astype(jnp.bfloat16).astype(jnp.float32)
    ref = jnp.dot(hb, w2b, precision=jax.lax.Precision.HIGHEST) + b2
    assert jnp.allclose(out, ref, atol=1e-3, rtol=1e-3)

    print("KERNEL_OK")
</pallas_src>

<mosaic_0001>
module attributes {stable_mosaic.version = 11 : i64} {
  func.func @_mlp_head_kernel(%arg0: i32, %arg1: i32, %arg2: memref<8x128xbf16, #tpu.memory_space<vmem>>, %arg3: memref<128x128xbf16, #tpu.memory_space<vmem>>, %arg4: memref<1x128xf32, #tpu.memory_space<vmem>>, %arg5: memref<128x128xbf16, #tpu.memory_space<vmem>>, %arg6: memref<1x128xf32, #tpu.memory_space<vmem>>, %arg7: memref<8x128xf32, #tpu.memory_space<vmem>>, %arg8: memref<8x128xf32, #tpu.memory_space<vmem>>) attributes {dimension_semantics = [#tpu.dimension_semantics<parallel>, #tpu.dimension_semantics<arbitrary>], iteration_bounds = array<i64: 1, 1>, scalar_prefetch = 0 : i64, scratch_operands = 1 : i64, tpu.core_type = #tpu.core_type<tc>, window_params = [{transform_indices = @transform_0, window_bounds = array<i64: 8, 128>}, {transform_indices = @transform_1, window_bounds = array<i64: 128, 128>}, {pipeline_mode = #tpu.pipeline_mode<synchronous>, transform_indices = @transform_2, window_bounds = array<i64: 1, 128>}, {pipeline_mode = #tpu.pipeline_mode<synchronous>, transform_indices = @transform_3, window_bounds = array<i64: 128, 128>}, {pipeline_mode = #tpu.pipeline_mode<synchronous>, transform_indices = @transform_4, window_bounds = array<i64: 1, 128>}, {transform_indices = @transform_5, window_bounds = array<i64: 8, 128>}]} {
    %c0_i32 = arith.constant 0 : i32
    %0 = arith.cmpi eq, %arg1, %c0_i32 : i32
    %1 = arith.extui %0 : i1 to i32
    %c0_i32_0 = arith.constant 0 : i32
    %2 = arith.cmpi ne, %1, %c0_i32_0 : i32
    scf.if %2 {
      %c0_10 = arith.constant 0 : index
      %c0_11 = arith.constant 0 : index
      %12 = vector.load %arg4[%c0_10, %c0_11] : memref<1x128xf32, #tpu.memory_space<vmem>>, vector<1x128xf32>
      %13 = vector.shape_cast %12 : vector<1x128xf32> to vector<1x128xf32>
      %14 = vector.broadcast %13 : vector<1x128xf32> to vector<8x128xf32>
      %c0_12 = arith.constant 0 : index
      %c0_13 = arith.constant 0 : index
      %15 = vector.load %arg8[%c0_12, %c0_13] : memref<8x128xf32, #tpu.memory_space<vmem>>, vector<8x128xf32>
      tpu.vector_store %arg8[%c0_12, %c0_13], %14 {strides = array<i32>} : memref<8x128xf32, #tpu.memory_space<vmem>>, vector<8x128xf32>,
    } else {
    }
    %c0 = arith.constant 0 : index
    %c0_1 = arith.constant 0 : index
    %3 = vector.load %arg8[%c0, %c0_1] : memref<8x128xf32, #tpu.memory_space<vmem>>, vector<8x128xf32>
    %c0_2 = arith.constant 0 : index
    %c0_3 = arith.constant 0 : index
    %4 = vector.load %arg2[%c0_2, %c0_3] : memref<8x128xbf16, #tpu.memory_space<vmem>>, vector<8x128xbf16>
    %c0_4 = arith.constant 0 : index
    %c0_5 = arith.constant 0 : index
    %5 = vector.load %arg3[%c0_4, %c0_5] : memref<128x128xbf16, #tpu.memory_space<vmem>>, vector<128x128xbf16>
    %cst = arith.constant dense<0.000000e+00> : vector<8x128xf32>
    %6 = tpu.matmul %4, %5, %cst {dimension_numbers = #tpu.dot_dimension_numbers<[1], [0], [0], [1], [0, 0, 1, 1], [], []>} : vector<8x128xbf16>, vector<128x128xbf16>, vector<8x128xf32> -> vector<8x128xf32>
    %7 = arith.addf %3, %6 : vector<8x128xf32>
    %c0_6 = arith.constant 0 : index
    %c0_7 = arith.constant 0 : index
    %8 = vector.load %arg8[%c0_6, %c0_7] : memref<8x128xf32, #tpu.memory_space<vmem>>, vector<8x128xf32>
    tpu.vector_store %arg8[%c0_6, %c0_7], %7 {strides = array<i32>} : memref<8x128xf32, #tpu.memory_space<vmem>>, vector<8x128xf32>,
    %c0_i32_8 = arith.constant 0 : i32
    %9 = arith.cmpi eq, %arg1, %c0_i32_8 : i32
    %10 = arith.extui %9 : i1 to i32
    %c0_i32_9 = arith.constant 0 : i32
    %11 = arith.cmpi ne, %10, %c0_i32_9 : i32
    scf.if %11 {
      %c0_10 = arith.constant 0 : index
      %c0_11 = arith.constant 0 : index
      %12 = vector.load %arg8[%c0_10, %c0_11] : memref<8x128xf32, #tpu.memory_space<vmem>>, vector<8x128xf32>
      %13 = arith.truncf %12 : vector<8x128xf32> to vector<8x128xbf16>
      %c0_12 = arith.constant 0 : index
      %c0_13 = arith.constant 0 : index
      %14 = vector.load %arg5[%c0_12, %c0_13] : memref<128x128xbf16, #tpu.memory_space<vmem>>, vector<128x128xbf16>
      %cst_14 = arith.constant dense<0.000000e+00> : vector<8x128xf32>
      %15 = tpu.matmul %13, %14, %cst_14 {dimension_numbers = #tpu.dot_dimension_numbers<[1], [0], [0], [1], [0, 0, 1, 1], [], []>} : vector<8x128xbf16>, vector<128x128xbf16>, vector<8x128xf32> -> vector<8x128xf32>
      %c0_15 = arith.constant 0 : index
      %c0_16 = arith.constant 0 : index
      %16 = vector.load %arg6[%c0_15, %c0_16] : memref<1x128xf32, #tpu.memory_space<vmem>>, vector<1x128xf32>
      %17 = vector.broadcast %16 : vector<1x128xf32> to vector<8x128xf32>
      %18 = arith.addf %15, %17 : vector<8x128xf32>
      %c0_17 = arith.constant 0 : index
      %c0_18 = arith.constant 0 : index
      %19 = vector.load %arg7[%c0_17, %c0_18] : memref<8x128xf32, #tpu.memory_space<vmem>>, vector<8x128xf32>
      tpu.vector_store %arg7[%c0_17, %c0_18], %18 {strides = array<i32>} : memref<8x128xf32, #tpu.memory_space<vmem>>, vector<8x128xf32>,
    } else {
    }
    return
  }
  func.func @transform_0(%arg0: i32, %arg1: i32) -> (i32, i32) {
    %c0_i32 = arith.constant 0 : i32
    return %arg0, %arg1 : i32, i32
  }
  func.func @transform_1(%arg0: i32, %arg1: i32) -> (i32, i32) {
    %c0_i32 = arith.constant 0 : i32
    %c0_i32_0 = arith.constant 0 : i32
    return %arg1, %c0_i32 : i32, i32
  }
  func.func @transform_2(%arg0: i32, %arg1: i32) -> (i32, i32) {
    %c0_i32 = arith.constant 0 : i32
    %c0_i32_0 = arith.constant 0 : i32
    %c0_i32_1 = arith.constant 0 : i32
    return %c0_i32, %c0_i32_0 : i32, i32
  }
  func.func @transform_3(%arg0: i32, %arg1: i32) -> (i32, i32) {
    %c0_i32 = arith.constant 0 : i32
    %c0_i32_0 = arith.constant 0 : i32
    %c0_i32_1 = arith.constant 0 : i32
    return %c0_i32, %c0_i32_0 : i32, i32
  }
  func.func @transform_4(%arg0: i32, %arg1: i32) -> (i32, i32) {
    %c0_i32 = arith.constant 0 : i32
    %c0_i32_0 = arith.constant 0 : i32
    %c0_i32_1 = arith.constant 0 : i32
    return %c0_i32, %c0_i32_0 : i32, i32
  }
  func.func @transform_5(%arg0: i32, %arg1: i32) -> (i32, i32) {
    %c0_i32 = arith.constant 0 : i32
    %c0_i32_0 = arith.constant 0 : i32
    return %arg0, %c0_i32 : i32, i32
  }
}

</mosaic_0001>

<bundles_post_ra>
// kernel: tpu_custom_call.1
= control target key start
LH: loop header
LB: loop body
LE: loop exit
PB: predicated region body
PF: predicated region fallthrough
CT: control target
= control target key end

     0   :  { %10 = vsyncpa [#allocation4], 0  ;;  %s505_s0 = inlined_call_operand.hbm [shape: bf16[8,128], index: 0, kind: input, shape index: {}]   ;;  %s506_s1 = inlined_call_operand.hbm [shape: bf16[128,128], index: 1, kind: input, shape index: {}]   ;;  %s507_s2 = inlined_call_operand.vmem [shape: f32[1,128], index: 2, kind: input, shape index: {}]   ;;  %s508_s3 = inlined_call_operand.hbm [shape: bf16[128,128], index: 3, kind: input, shape index: {}]   ;;  %s509_s4 = inlined_call_operand.vmem [shape: f32[1,128], index: 4, kind: input, shape index: {}]   ;;  %s510_s5 = inlined_call_operand.hbm [shape: f32[8,128], index: 5, kind: output, shape index: {}]  }
   0x1   :  { %11 = vsyncpa [#allocation7], 0  ;;  %s28_s20 = sshll.u32 %s506_s1, 4  ;;  %s29_s20 = int_to_ptr.hbm [resolvable:$true] %s28_s20 }
   0x2   :  { %12 = vsyncpa [#allocation5], 0  ;;  %s451_s21 = smov [#allocation6]   ;;  %s18_s25 = sshll.u32 %s505_s0, 4  ;;  %s19_s25 = int_to_ptr.hbm [resolvable:$true] %s18_s25 }
   0x3   :  { %s30_s22 = sshll.u32 %s451_s21, 4  ;;  %s452_s26 = smov 64   ;;  %s31_s22 = int_to_ptr.vmem [resolvable:$true] %s30_s22 }
   0x4   :  { %s453_s27 = smov 4   ;;  %s454_s28 = smov [#allocation3]  }
   0x5   :  { %36 = dma.hbm_to_vmem [thread:$0]  %s29_s20, 1024, %s31_s22, [#allocation7], %s452_s26, %s452_s26, %s453_s27  }
   0x6   :  { %s20_s29 = sshll.u32 %s454_s28, 4  ;;  %s43_s7 = sshll.u32 %s508_s3, 4  ;;  %s21_s29 = int_to_ptr.vmem [resolvable:$true] %s20_s29  ;;  %s44_s7 = int_to_ptr.hbm [resolvable:$true] %s43_s7 }
   0x7   :  { %23 = dma.hbm_to_vmem [thread:$0]  %s19_s25, 64, %s21_s29, [#allocation4]  }
   0x8   :  { %s455_s1 = smov [#allocation8]  }
   0x9   :  { %s45_s8 = sshll.u32 %s455_s1, 4  ;;  %s46_s8 = int_to_ptr.vmem [resolvable:$true] %s45_s8 }
   0xa   :  { %51 = dma.hbm_to_vmem [thread:$0]  %s44_s7, 1024, %s46_s8, [#allocation7], %s452_s26, %s452_s26, %s453_s27  }
   0xb   :  { %445 = dma.done.wait [#allocation4], 64  }
   0xc   :  { %446 = vsyncadd [#allocation4], 4294967232 }
   0xd   :  { %447 = dma.done.wait [#allocation7], 2048  }
   0xe   :  { %448 = vsyncadd [#allocation7], 4294965248  ;;  %v332_v0 = vld [vmem:[#allocation6 + $0x38] sm:$0xff]  ;;  %v331_v1 = vld [vmem:[#allocation6 + $0x30] sm:$0xff]  ;;  %s456_s11 = smov [#allocation9]   ;;  %s250_s15 = sshll.u32 %s510_s5, 4  ;;  %s251_s15 = int_to_ptr.hbm [resolvable:$true] %s250_s15 }
   0xf   :  { %141 = vmatpush.bf16.msra.mxu0 %v332_v0  ;;  %v340_v2 = vld [vmem:[#allocation8 + $0x38] sm:$0xff]  ;;  %v339_v3 = vld [vmem:[#allocation8 + $0x30] sm:$0xff]  ;;  %v330_v4 = vld [vmem:[#allocation6 + $0x28] sm:$0xff]  ;;  %s248_s12 = sshll.u32 %s456_s11, 4  ;;  %s249_s12 = int_to_ptr.vmem [resolvable:$true] %s248_s12 }
  0x10   :  { %229 = vmatpush.bf16.msra.mxu1 %v340_v2  ;;  %v338_v5 = vld [vmem:[#allocation8 + $0x28] sm:$0xff]  ;;  %v329_v6 = vld [vmem:[#allocation6 + $0x20] sm:$0xff]  ;;  %v328_v8 = vld [vmem:[#allocation6 + $0x18] sm:$0xff] }
  0x11   :  { %v337_v7 = vld [vmem:[#allocation8 + $0x20] sm:$0xff]  ;;  %v336_v9 = vld [vmem:[#allocation8 + $0x18] sm:$0xff]  ;;  %v327_v10 = vld [vmem:[#allocation6 + $0x10] sm:$0xff] }
  0x12   :  { %v335_v11 = vld [vmem:[#allocation8 + $0x10] sm:$0xff]  ;;  %v326_v12 = vld [vmem:[#allocation6 + $0x8] sm:$0xff]  ;;  %v325_v14 = vld [vmem:[#allocation6] sm:$0xff] }
  0x13   :  { %142 = vmatpush.bf16.msra.mxu0 %v331_v1  ;;  %v334_v13 = vld [vmem:[#allocation8 + $0x8] sm:$0xff]  ;;  %v76_v15 = vld [vmem:[#allocation3] sm:$0xf]  ;;  %v333_v16 = vld [vmem:[#allocation8] sm:$0xff] }
  0x14   :  { %230 = vmatpush.bf16.msra.mxu1 %v339_v3  ;;  %v347_v17 = vld [vmem:[%s507_s2] ss:$0 sm:$0xff] }
  0x15   :  { %v348_v22 = vld [vmem:[%s509_s4] ss:$0 sm:$0xff] }
  0x17   :  { %143 = vmatpush.bf16.msra.mxu0 %v330_v4 }
  0x18   :  { %231 = vmatpush.bf16.msra.mxu1 %v338_v5 }
  0x1b   :  { %144 = vmatpush.bf16.msra.mxu0 %v329_v6 }
  0x1c   :  { %232 = vmatpush.bf16.msra.mxu1 %v337_v7 }
  0x1f   :  { %145 = vmatpush.bf16.msra.mxu0 %v328_v8 }
  0x20   :  { %233 = vmatpush.bf16.msra.mxu1 %v336_v9 }
  0x23   :  { %146 = vmatpush.bf16.msra.mxu0 %v327_v10 }
  0x24   :  { %234 = vmatpush.bf16.msra.mxu1 %v335_v11 }
  0x27   :  { %147 = vmatpush.bf16.msra.mxu0 %v326_v12 }
  0x28   :  { %235 = vmatpush.bf16.msra.mxu1 %v334_v13 }
  0x2b   :  { %148 = vmatpush.bf16.msra.mxu0 %v325_v14 }
  0x2c   :  { %236 = vmatpush.bf16.msra.mxu1 %v333_v16 }
  0x2e   :  { %149 = vmatmul.bf16.vlgmr.msra.gmra.mxu0 %v76_v15 }
  0xab   :  { %v150_v18 = vpop.f32.mrf.mxu0 }
  0xac   :  { %v154_v19 = vadd.f32 %v347_v17, %v150_v18 }
  0xae   :  { %v160_v20 = vpack.c.bf16 %v154_v19, %v154_v19 }
  0xb0   :  { %237 = vmatmul.bf16.vlgmr.msra.gmra.mxu1 %v160_v20 }
  0xb3   :  { %v152_v21 = vpop.f32.mrf.mxu0 }
 0x12d   :  { %v238_v23 = vpop.f32.mrf.mxu1 }
 0x12e   :  { %v239_v24 = vadd.f32 %v348_v22, %v238_v23 }
 0x130   :  { %242 = vst [vmem:[#allocation9] sm:$0xff] %v239_v24 }
 0x131   :  { %253 = dma.vmem_to_hbm [thread:$0]  %s249_s12, 128, %s251_s15, [#allocation5]  }
 0x135   :  { %v240_v25 = vpop.f32.mrf.mxu1 }
 0x136   :  { %449 = dma.done.wait [#allocation5], 128  }
 0x137   :  { %450 = vsyncadd [#allocation5], 4294967168 }
 0x138   :  { %258 = vsyncpa [#allocation4], 1 }
 0x139   :  { %259 = vsyncpa [#allocation7], 1 }
 0x13a   :  { %260 = vsyncpa [#allocation5], 1 }

</bundles_post_ra>
